<compile_context>
chip_gen: v6e
topology: v6e:2x2x1
jax: 0.10.0
libtpu: 0.0.40
codegen_flags: <defaults>
</compile_context>

<pallas_src>
import jax
import jax.numpy as jnp
from jax.experimental import pallas as pl
from jax.experimental.pallas import tpu as pltpu

IN_FEATURES = 784            # 28*28, as implied by nn.Linear(784, 10)
NUM_CLASSES = 10
OUT_PAD = 128                # lane-dense logits / output columns
TILE_B_MAX = 1024            # rows per grid step
NEG_BIG = -1e30              # "-inf" for padded class columns (finite in f32)


def _round_up(x, m):
    return (x + m - 1) // m * m


def _cdiv(a, b):
    return -(-a // b)


def linear_softmax_kernel(x_ref, w_ref, b_ref, o_ref):
    # x_ref: (tile_b, 784) f32    w_ref: (784, 128) bf16 (resident)
    # b_ref: (1, 128) f32         o_ref: (tile_b, 128) bf16
    x_bf = x_ref[...].astype(jnp.bfloat16)          # cast just before the MXU
    logits = jnp.dot(
        x_bf, w_ref[...], preferred_element_type=jnp.float32
    ) + b_ref[...]                                   # f32 logit path (keeps -1e30 safe)
    # Numerically stable softmax over the class axis, all f32.
    m = jnp.max(logits, axis=1, keepdims=True)
    e = jnp.exp(logits - m)
    denom = jnp.sum(e, axis=1, keepdims=True)
    inv = 1.0 / denom                                # exact reciprocal (approx drifted row-sums)
    o_ref[...] = (e * inv).astype(o_ref.dtype)       # bf16 store only at the end


def net_forward(x, w, b):
    """x: (B, 1, 28, 28) or any (B, ...) flattening to 784. Returns (B, 10) f32."""
    batch = x.shape[0]
    x2d = x.reshape(batch, -1).astype(jnp.float32)
    assert x2d.shape[1] == IN_FEATURES, x2d.shape

    # Even batch split; prefer >=2 grid steps (megacore sharding on v7x) when
    # the batch is large enough that each tile keeps >=8 rows.
    n_tiles = max(_cdiv(batch, TILE_B_MAX), 2 if batch >= 16 else 1)
    tile_b = _round_up(_cdiv(batch, n_tiles), 8)
    padded_batch = n_tiles * tile_b
    if padded_batch != batch:
        # Rare ragged case only; no column padding, no dtype cast of x.
        x2d = jnp.pad(x2d, ((0, padded_batch - batch), (0, 0)))

    # Weights: (784, 10) -> (784, 128) bf16, DMA'd once and resident in VMEM.
    w_pad = jnp.zeros((IN_FEATURES, OUT_PAD), jnp.bfloat16)
    w_pad = w_pad.at[:, :NUM_CLASSES].set(w.astype(jnp.bfloat16))

    # Bias: padded class columns get a huge negative value -> exp underflows to 0.
    b_pad = jnp.full((1, OUT_PAD), NEG_BIG, jnp.float32)
    b_pad = b_pad.at[0, :NUM_CLASSES].set(b.astype(jnp.float32))

    out = pl.pallas_call(
        linear_softmax_kernel,
        out_shape=jax.ShapeDtypeStruct((padded_batch, OUT_PAD), jnp.bfloat16),
        grid_spec=pltpu.PrefetchScalarGridSpec(
            num_scalar_prefetch=0,
            grid=(n_tiles,),
            in_specs=[
                # Block spans the full K dim (784 == array dim, so the 128-lane
                # divisibility rule does not apply); Mosaic pads lanes in VMEM.
                pl.BlockSpec((tile_b, IN_FEATURES), lambda i: (i, 0)),
                # W and b map to the same block every step -> resident.
                pl.BlockSpec((IN_FEATURES, OUT_PAD), lambda i: (0, 0)),
                pl.BlockSpec((1, OUT_PAD), lambda i: (0, 0)),
            ],
            out_specs=pl.BlockSpec((tile_b, OUT_PAD), lambda i: (i, 0)),
        ),
        compiler_params=pltpu.CompilerParams(
            # Batch-parallel, reduction-free -> shard across TCs on v7x megacore.
            dimension_semantics=("parallel",),
        ),
    )(x2d, w_pad, b_pad)

    # Slice away padded rows/columns; tiny (B, 10) cast back to f32 to match the
    # module's output dtype.
    return out[:batch, :NUM_CLASSES].astype(jnp.float32)


def init_params(key):
    """Deterministic init mimicking PyTorch nn.Linear default (U[-k, k], k=1/sqrt(fan_in))."""
    kw, kb = jax.random.split(key)
    bound = 1.0 / jnp.sqrt(jnp.float32(IN_FEATURES))
    # Stored as (in, out) so the kernel computes x @ W directly.
    w = jax.random.uniform(
        kw, (IN_FEATURES, NUM_CLASSES), jnp.float32, -bound, bound
    )
    b = jax.random.uniform(kb, (NUM_CLASSES,), jnp.float32, -bound, bound)
    return w, b


def _reference(x, w, b):
    x2d = x.reshape(x.shape[0], -1).astype(jnp.float32)
    logits = x2d @ w + b
    return jax.nn.softmax(logits, axis=1)


if __name__ == "__main__":
    key = jax.random.PRNGKey(0)
    k_x, k_p = jax.random.split(key)

    batch = 8
    # MNIST-like NCHW input: (B, 1, 28, 28) flattens to 784 features.
    x = jax.random.normal(k_x, (batch, 1, 28, 28), jnp.float32)
    w, b = init_params(k_p)

    out = jax.block_until_ready(net_forward(x, w, b))

    # Sanity: shape, rows sum to 1 (within bf16 output rounding), matches
    # pure-JAX f32 reference within bf16-stream tolerance.
    assert out.shape == (batch, NUM_CLASSES)
    assert out.dtype == jnp.float32
    row_sums = jnp.sum(out, axis=1)
    assert jnp.allclose(row_sums, 1.0, atol=1e-2), row_sums
    ref = _reference(x, w, b)
    assert jnp.allclose(out, ref, atol=3e-2), float(jnp.max(jnp.abs(out - ref)))

    print("KERNEL_OK")
</pallas_src>

<mosaic_0001>
module attributes {stable_mosaic.version = 11 : i64} {
  func.func @linear_softmax_kernel(%arg0: i32, %arg1: memref<8x784xf32, #tpu.memory_space<vmem>>, %arg2: memref<784x128xbf16, #tpu.memory_space<vmem>>, %arg3: memref<1x128xf32, #tpu.memory_space<vmem>>, %arg4: memref<8x128xbf16, #tpu.memory_space<vmem>>) attributes {dimension_semantics = [#tpu.dimension_semantics<parallel>], iteration_bounds = array<i64: 1>, scalar_prefetch = 0 : i64, scratch_operands = 0 : i64, tpu.core_type = #tpu.core_type<tc>, window_params = [{transform_indices = @transform_0, window_bounds = array<i64: 8, 784>}, {pipeline_mode = #tpu.pipeline_mode<synchronous>, transform_indices = @transform_1, window_bounds = array<i64: 784, 128>}, {pipeline_mode = #tpu.pipeline_mode<synchronous>, transform_indices = @transform_2, window_bounds = array<i64: 1, 128>}, {transform_indices = @transform_3, window_bounds = array<i64: 8, 128>}]} {
    %c0 = arith.constant 0 : index
    %c0_0 = arith.constant 0 : index
    %0 = vector.load %arg1[%c0, %c0_0] : memref<8x784xf32, #tpu.memory_space<vmem>>, vector<8x784xf32>
    %1 = arith.truncf %0 : vector<8x784xf32> to vector<8x784xbf16>
    %c0_1 = arith.constant 0 : index
    %c0_2 = arith.constant 0 : index
    %2 = vector.load %arg2[%c0_1, %c0_2] : memref<784x128xbf16, #tpu.memory_space<vmem>>, vector<784x128xbf16>
    %cst = arith.constant dense<0.000000e+00> : vector<8x128xf32>
    %3 = tpu.matmul %1, %2, %cst {dimension_numbers = #tpu.dot_dimension_numbers<[1], [0], [0], [1], [0, 0, 1, 1], [], []>} : vector<8x784xbf16>, vector<784x128xbf16>, vector<8x128xf32> -> vector<8x128xf32>
    %c0_3 = arith.constant 0 : index
    %c0_4 = arith.constant 0 : index
    %4 = vector.load %arg3[%c0_3, %c0_4] : memref<1x128xf32, #tpu.memory_space<vmem>>, vector<1x128xf32>
    %5 = vector.broadcast %4 : vector<1x128xf32> to vector<8x128xf32>
    %6 = arith.addf %3, %5 : vector<8x128xf32>
    %cst_5 = arith.constant dense<0xFF800000> : vector<8xf32>
    %7 = vector.multi_reduction <maximumf>, %6, %cst_5 [1] : vector<8x128xf32> to vector<8xf32>
    %8 = vector.shape_cast %7 : vector<8xf32> to vector<8x1xf32>
    %9 = vector.broadcast %8 : vector<8x1xf32> to vector<8x128xf32>
    %10 = arith.subf %6, %9 : vector<8x128xf32>
    %11 = math.exp %10 : vector<8x128xf32>
    %cst_6 = arith.constant dense<0.000000e+00> : vector<8xf32>
    %12 = vector.multi_reduction <add>, %11, %cst_6 [1] : vector<8x128xf32> to vector<8xf32>
    %13 = vector.shape_cast %12 : vector<8xf32> to vector<8x1xf32>
    %cst_7 = arith.constant 1.000000e+00 : f32
    %14 = vector.broadcast %cst_7 : f32 to vector<8x1xf32>
    %15 = arith.divf %14, %13 : vector<8x1xf32>
    %16 = vector.broadcast %15 : vector<8x1xf32> to vector<8x128xf32>
    %17 = arith.mulf %11, %16 : vector<8x128xf32>
    %18 = arith.truncf %17 : vector<8x128xf32> to vector<8x128xbf16>
    %c0_8 = arith.constant 0 : index
    %c0_9 = arith.constant 0 : index
    %19 = vector.load %arg4[%c0_8, %c0_9] : memref<8x128xbf16, #tpu.memory_space<vmem>>, vector<8x128xbf16>
    tpu.vector_store %arg4[%c0_8, %c0_9], %18 {strides = array<i32>} : memref<8x128xbf16, #tpu.memory_space<vmem>>, vector<8x128xbf16>,
    return
  }
  func.func @transform_0(%arg0: i32) -> (i32, i32) {
    %c0_i32 = arith.constant 0 : i32
    %c0_i32_0 = arith.constant 0 : i32
    return %arg0, %c0_i32 : i32, i32
  }
  func.func @transform_1(%arg0: i32) -> (i32, i32) {
    %c0_i32 = arith.constant 0 : i32
    %c0_i32_0 = arith.constant 0 : i32
    %c0_i32_1 = arith.constant 0 : i32
    return %c0_i32, %c0_i32_0 : i32, i32
  }
  func.func @transform_2(%arg0: i32) -> (i32, i32) {
    %c0_i32 = arith.constant 0 : i32
    %c0_i32_0 = arith.constant 0 : i32
    %c0_i32_1 = arith.constant 0 : i32
    return %c0_i32, %c0_i32_0 : i32, i32
  }
  func.func @transform_3(%arg0: i32) -> (i32, i32) {
    %c0_i32 = arith.constant 0 : i32
    %c0_i32_0 = arith.constant 0 : i32
    return %arg0, %c0_i32 : i32, i32
  }
}

</mosaic_0001>

<bundles_post_ra>
// kernel: tpu_custom_call.1
= control target key start
LH: loop header
LB: loop body
LE: loop exit
PB: predicated region body
PF: predicated region fallthrough
CT: control target
= control target key end

     0   :  { %8 = vsyncpa [#allocation3], 0  ;;  %s937_s0 = inlined_call_operand.hbm [shape: f32[8,784], index: 0, kind: input, shape index: {}]   ;;  %s938_s1 = inlined_call_operand.hbm [shape: bf16[784,128], index: 1, kind: input, shape index: {}]   ;;  %s939_s2 = inlined_call_operand.vmem [shape: f32[1,128], index: 2, kind: input, shape index: {}]   ;;  %s940_s3 = inlined_call_operand.hbm [shape: bf16[8,128], index: 3, kind: output, shape index: {}]  }
   0x1   :  { %9 = vsyncpa [#allocation6], 0 }
   0x2   :  { %10 = vsyncpa [#allocation4], 0  ;;  %s898_s12 = smov [#allocation2]   ;;  %s899_s14 = smov [#allocation5]  }
   0x3   :  { %s17_s13 = sshll.u32 %s898_s12, 4  ;;  %s26_s15 = sshll.u32 %s899_s14, 4  ;;  %s18_s13 = int_to_ptr.vmem [resolvable:$true] %s17_s13  ;;  %s27_s15 = int_to_ptr.vmem [resolvable:$true] %s26_s15 }
   0x4   :  { %s840_s16 = scalar_lea.vmem %s18_s13, 896  ;;  %p845_p1 = scmp.lt.s32.totalorder %s18_s13, %s18_s13 }
   0x5   :  { %p841_p0 = scmp.ne.s32.totalorder %s18_s13, %s840_s16  ;;  %p846_p2 = scmp.lt.s32.totalorder %s840_s16, %s840_s16 }
   0x7   :  { %p847_p3 = por %p846_p2, %p845_p1 }
   0x9   :  { %p848_p4 = pnand %p847_p3, %p841_p0 }
   0xb   :  { %851 = shalt.err (!%p848_p4)
}
   0xc   :  { %20 = dma.hbm_to_vmem [thread:$0]  %s937_s0, 896, %s18_s13, [#allocation3]  }
   0xd   :  { %s860_s19 = scalar_lea.vmem %s27_s15, 6272  ;;  %p865_p6 = scmp.lt.s32.totalorder %s27_s15, %s27_s15 }
   0xe   :  { %p861_p5 = scmp.ne.s32.totalorder %s27_s15, %s860_s19  ;;  %p866_p7 = scmp.lt.s32.totalorder %s860_s19, %s860_s19 }
  0x10   :  { %p867_p8 = por %p866_p7, %p865_p6 }
  0x12   :  { %p868_p9 = pnand %p867_p8, %p861_p5 }
  0x14   :  { %871 = shalt.err (!%p868_p9)
}
  0x15   :  { %s900_s20 = smov 64   ;;  %s901_s21 = smov 4  }
  0x16   :  { %32 = dma.hbm_to_vmem [thread:$0]  %s938_s1, 6272, %s27_s15, [#allocation6], %s900_s20, %s900_s20, %s901_s21  }
  0x17   :  { %892 = dma.done.wait [#allocation3], 896  }
  0x18   :  { %893 = vsyncadd [#allocation3], 4294966400 }
  0x19   :  { %894 = dma.done.wait [#allocation6], 6272  }
  0x1a   :  { %895 = vsyncadd [#allocation6], 4294961024  ;;  %v779_v0 = vld [vmem:[#allocation5 + $0x78] sm:$0xff]   ;;  %v783_v4 = vld [vmem:[#allocation5 + $0x70] sm:$0xff]   ;;  %v902_v44 = vmov 0.0   ;;  %vm903_vm0 = vmmov 0  }
  0x1b   :  { %v780_v1 = vld [vmem:[#allocation5 + $0x38] sm:$0xff]   ;;  %698 = vmatprep.subr.bf16.mxu0 %v779_v0  ;;  %v784_v5 = vld [vmem:[#allocation5 + $0x30] sm:$0xff]   ;;  %v787_v8 = vld [vmem:[#allocation5 + $0x68] sm:$0xff]   ;;  %vm455_vm1 = vcmask 130048  }
  0x1c   :  { %v781_v2 = vld [vmem:[#allocation5 + $0xf8] sm:$0xff]   ;;  %699 = vmatpush3.bf16.msra.mxu0 %v780_v1  ;;  %v785_v6 = vld [vmem:[#allocation5 + $0xf0] sm:$0xff]   ;;  %v788_v9 = vld [vmem:[#allocation5 + $0x28] sm:$0xff]  }
  0x1d   :  { %v782_v3 = vld [vmem:[#allocation5 + $0xb8] sm:$0xff]   ;;  %720 = vmatprep.subr.bf16.mxu1 %v781_v2  ;;  %700 = vmatprep.subr.bf16.mxu0 %v783_v4  ;;  %v786_v7 = vld [vmem:[#allocation5 + $0xb0] sm:$0xff]   ;;  %v789_v10 = vld [vmem:[#allocation5 + $0xe8] sm:$0xff]  }
  0x1e   :  { %721 = vmatpush3.bf16.msra.mxu1 %v782_v3  ;;  %v790_v11 = vld [vmem:[#allocation5 + $0xa8] sm:$0xff]   ;;  %v791_v12 = vld [vmem:[#allocation5 + $0x60] sm:$0xff]   ;;  %v795_v16 = vld [vmem:[#allocation5 + $0x58] sm:$0xff]  }
  0x1f   :  { %722 = vmatprep.subr.bf16.mxu1 %v785_v6  ;;  %v792_v13 = vld [vmem:[#allocation5 + $0x20] sm:$0xff]   ;;  %v796_v17 = vld [vmem:[#allocation5 + $0x18] sm:$0xff]   ;;  %v799_v20 = vld [vmem:[#allocation5 + $0x50] sm:$0xff]  }
  0x20   :  { %701 = vmatpush3.bf16.msra.mxu0 %v784_v5  ;;  %v793_v14 = vld [vmem:[#allocation5 + $0xe0] sm:$0xff]   ;;  %v797_v18 = vld [vmem:[#allocation5 + $0xd8] sm:$0xff]   ;;  %v800_v21 = vld [vmem:[#allocation5 + $0x10] sm:$0xff]  }
  0x21   :  { %702 = vmatprep.subr.bf16.mxu0 %v787_v8  ;;  %v794_v15 = vld [vmem:[#allocation5 + $0xa0] sm:$0xff]   ;;  %v798_v19 = vld [vmem:[#allocation5 + $0x98] sm:$0xff]   ;;  %v801_v22 = vld [vmem:[#allocation5 + $0xd0] sm:$0xff]  }
  0x22   :  { %723 = vmatpush3.bf16.msra.mxu1 %v786_v7  ;;  %v802_v23 = vld [vmem:[#allocation5 + $0x90] sm:$0xff]   ;;  %v803_v24 = vld [vmem:[#allocation5 + $0x48] sm:$0xff]   ;;  %v807_v28 = vld [vmem:[#allocation5 + $0x40] sm:$0xff]  }
  0x23   :  { %724 = vmatprep.subr.bf16.mxu1 %v789_v10  ;;  %v804_v25 = vld [vmem:[#allocation5 + $0x8] sm:$0xff]   ;;  %v808_v29 = vld [vmem:[#allocation5] sm:$0xff]   ;;  %v43_v31 = vld [vmem:[#allocation2 + $0x8] sm:$0xff] }
  0x24   :  { %703 = vmatpush3.bf16.msra.mxu0 %v788_v9  ;;  %v805_v26 = vld [vmem:[#allocation5 + $0xc8] sm:$0xff]   ;;  %v809_v30 = vld [vmem:[#allocation5 + $0xc0] sm:$0xff]   ;;  %v50_v32 = vpack.c.bf16 %v43_v31, %v43_v31  ;;  %v811_v36 = vld [vmem:[#allocation5 + $0x178] sm:$0xff]  }
  0x25   :  { %704 = vmatprep.subr.bf16.mxu0 %v791_v12  ;;  %v806_v27 = vld [vmem:[#allocation5 + $0x88] sm:$0xff]   ;;  %v810_v33 = vld [vmem:[#allocation5 + $0x80] sm:$0xff]   ;;  %v812_v39 = vld [vmem:[#allocation5 + $0x138] sm:$0xff]  }
  0x26   :  { %725 = vmatpush3.bf16.msra.mxu1 %v790_v11  ;;  %v42_v34 = vld [vmem:[#allocation2] sm:$0xff]  ;;  %v45_v37 = vld [vmem:[#allocation2 + $0x18] sm:$0xff]  ;;  %491 = vmatprep.mubr.bf16.mxu0 %v50_v32  ;;  %v44_v40 = vld [vmem:[#allocation2 + $0x10] sm:$0xff] }
  0x27   :  { %726 = vmatprep.subr.bf16.mxu1 %v793_v14  ;;  %v49_v35 = vpack.c.bf16 %v42_v34, %v42_v34  ;;  %v52_v38 = vpack.c.bf16 %v45_v37, %v45_v37  ;;  %v51_v41 = vpack.c.bf16 %v44_v40, %v44_v40  ;;  %v813_v42 = vld [vmem:[#allocation5 + $0x170] sm:$0xff]   ;;  %v815_v45 = vld [vmem:[#allocation5 + $0x168] sm:$0xff]   ;;  %v817_v47 = vld [vmem:[#allocation5 + $0x160] sm:$0xff]  }
  0x28   :  { %705 = vmatpush3.bf16.msra.mxu0 %v792_v13  ;;  %v814_v43 = vld [vmem:[#allocation5 + $0x130] sm:$0xff]   ;;  %v816_v46 = vld [vmem:[#allocation5 + $0x128] sm:$0xff]   ;;  %v818_v48 = vld [vmem:[#allocation5 + $0x120] sm:$0xff]  }
  0x29   :  { %706 = vmatprep.subr.bf16.mxu0 %v795_v16  ;;  %531 = vmatprep.mubr.bf16.mxu1 %v52_v38  ;;  %v819_v49 = vld [vmem:[#allocation5 + $0x158] sm:$0xff]   ;;  %v821_v51 = vld [vmem:[#allocation5 + $0x150] sm:$0xff]   ;;  %v827_v52 = vld [vmem:[#allocation5 + $0x180] sm:$0xff]  }
  0x2a   :  { %727 = vmatpush3.bf16.msra.mxu1 %v794_v15  ;;  %v820_v50 = vld [vmem:[#allocation5 + $0x118] sm:$0xff]   ;;  %v47_v53 = vld [vmem:[#allocation2 + $0x28] sm:$0xff]  ;;  %v823_v58 = vld [vmem:[#allocation5 + $0x148] sm:$0xff]  }
  0x2b   :  { %728 = vmatprep.subr.bf16.mxu1 %v797_v18  ;;  %v54_v54 = vpack.c.bf16 %v47_v53, %v47_v53  ;;  %v48_v55 = vld [vmem:[#allocation2 + $0x30] sm:$0xff]  ;;  %v822_v56 = vld [vmem:[#allocation5 + $0x110] sm:$0xff]   ;;  %v824_v59 = vld [vmem:[#allocation5 + $0x108] sm:$0xff]  }
  0x2c   :  { %707 = vmatpush3.bf16.msra.mxu0 %v796_v17  ;;  %v55_v57 = vpack.c.bf16 %v48_v55, %v48_v55  ;;  %v825_v60 = vld [vmem:[#allocation5 + $0x140] sm:$0xff]   ;;  %v46_v62 = vld [vmem:[#allocation2 + $0x20] sm:$0xff] }
  0x2d   :  { %708 = vmatprep.subr.bf16.mxu0 %v799_v20  ;;  %v826_v61 = vld [vmem:[#allocation5 + $0x100] sm:$0xff]   ;;  %v53_v63 = vpack.c.bf16 %v46_v62, %v46_v62  ;;  %v647_v13 = vld [vmem:[%s939_s2] ss:$0 sm:$0xff]  ;;  %s904_s2 = smov [#allocation7]  }
  0x2e   :  { %729 = vmatpush3.bf16.msra.mxu1 %v798_v19  ;;  %s637_s24 = sshll.u32 %s904_s2, 4  ;;  %s638_s24 = int_to_ptr.vmem [resolvable:$true] %s637_s24 }
  0x2f   :  { %730 = vmatprep.subr.bf16.mxu1 %v801_v22  ;;  %s872_s25 = scalar_lea.vmem %s638_s24, 64  ;;  %p877_p11 = scmp.lt.s32.totalorder %s638_s24, %s638_s24 }
  0x30   :  { %709 = vmatpush3.bf16.msra.mxu0 %v800_v21  ;;  %p873_p10 = scmp.ne.s32.totalorder %s638_s24, %s872_s25  ;;  %p878_p12 = scmp.lt.s32.totalorder %s872_s25, %s872_s25 }
  0x31   :  { %710 = vmatprep.subr.bf16.mxu0 %v803_v24 }
  0x32   :  { %731 = vmatpush3.bf16.msra.mxu1 %v802_v23  ;;  %p879_p13 = por %p878_p12, %p877_p11 }
  0x33   :  { %732 = vmatprep.subr.bf16.mxu1 %v805_v26 }
  0x34   :  { %711 = vmatpush3.bf16.msra.mxu0 %v804_v25  ;;  %p880_p0 = pnand %p879_p13, %p873_p10 }
  0x35   :  { %712 = vmatprep.subr.bf16.mxu0 %v807_v28 }
  0x36   :  { %733 = vmatpush3.bf16.msra.mxu1 %v806_v27 }
  0x37   :  { %734 = vmatprep.subr.bf16.mxu1 %v809_v30 }
  0x38   :  { %713 = vmatpush3.bf16.msra.mxu0 %v808_v29 }
  0x39   :  { %742 = vmatprep.subr.bf16.mxu0 %v811_v36 }
  0x3a   :  { %735 = vmatpush3.bf16.msra.mxu1 %v810_v33 }
  0x3b   :  { %492 = vmatmul.mubr.bf16.vlgmr.msra.gmra.mxu0 %v49_v35  ;;  %766 = vmatprep.subr.bf16.mxu1 %v902_v44 }
  0x3c   :  { %743 = vmatpush3.bf16.msra.mxu0 %v812_v39  ;;  %571 = vmatprep.mubr.bf16.mxu0 %v54_v54 }
  0x3d   :  { %532 = vmatmul.mubr.bf16.vlgmr.msra.gmra.mxu1 %v51_v41  ;;  %744 = vmatprep.subr.bf16.mxu0 %v813_v42 }
  0x3e   :  { %768 = vmatprep.mubr.msk.bf16.mxu1 %vm903_vm0, %v902_v44  ;;  %767 = vmatpush3.bf16.msra.mxu1 %v827_v52 }
  0x40   :  { %745 = vmatpush3.bf16.msra.mxu0 %v814_v43 }
  0x41   :  { %746 = vmatprep.subr.bf16.mxu0 %v815_v45 }
  0x44   :  { %747 = vmatpush3.bf16.msra.mxu0 %v816_v46 }
  0x45   :  { %748 = vmatprep.subr.bf16.mxu0 %v817_v47  ;;  %769 = vmatmul.mubr.msk.bf16.vlgmr.msra.gmra.mxu1 %vm455_vm1, %v55_v57 }
  0x48   :  { %749 = vmatpush3.bf16.msra.mxu0 %v818_v48 }
  0x49   :  { %750 = vmatprep.subr.bf16.mxu0 %v819_v49 }
  0x4c   :  { %751 = vmatpush3.bf16.msra.mxu0 %v820_v50 }
  0x4d   :  { %752 = vmatprep.subr.bf16.mxu0 %v821_v51 }
  0x50   :  { %753 = vmatpush3.bf16.msra.mxu0 %v822_v56 }
  0x51   :  { %754 = vmatprep.subr.bf16.mxu0 %v823_v58 }
  0x54   :  { %755 = vmatpush3.bf16.msra.mxu0 %v824_v59 }
  0x55   :  { %756 = vmatprep.subr.bf16.mxu0 %v825_v60 }
  0x58   :  { %757 = vmatpush3.bf16.msra.mxu0 %v826_v61 }
  0x5b   :  { %572 = vmatmul.mubr.bf16.vlgmr.msra.gmra.mxu0 %v53_v63 }
  0xfb   :  { %v714_v0 = vpop.f32.mrf.mxu0 }
  0xfd   :  { %v715_v1 = vpop.f32.mrf.mxu0  ;;  %v736_v2 = vpop.f32.mrf.mxu1 }
  0xfe   :  { %v716_v12 = vadd.f32 %v715_v1, %v714_v0 }
  0xff   :  { %v717_v3 = vpop.f32.mrf.mxu0  ;;  %v737_v4 = vpop.f32.mrf.mxu1 }
 0x100   :  { %v494_v14 = vadd.f32 %v716_v12, %v647_v13  ;;  %v738_v15 = vadd.f32 %v737_v4, %v736_v2 }
 0x101   :  { %v718_v5 = vpop.f32.mrf.mxu0  ;;  %v739_v6 = vpop.f32.mrf.mxu1 }
 0x102   :  { %v534_v18 = vadd.f32 %v738_v15, %v494_v14 }
 0x103   :  { %v740_v7 = vpop.f32.mrf.mxu1 }
 0x105   :  { %v613_v8 = vpop.f32.mrf.mxu1 }
 0x107   :  { %v770_v9 = vpop.f32.mrf.mxu1 }
 0x109   :  { %v616_v10 = vpop.f32.mrf.mxu1 }
 0x10b   :  { %v771_v11 = vpop.f32.mrf.mxu1 }
 0x11b   :  { %v758_v16 = vpop.f32.mrf.mxu0 }
 0x11d   :  { %v759_v17 = vpop.f32.mrf.mxu0 }
 0x11e   :  { %v760_v19 = vadd.f32 %v759_v17, %v758_v16 }
 0x11f   :  { %v761_v20 = vpop.f32.mrf.mxu0 }
 0x120   :  { %v574_v21 = vadd.f32 %v760_v19, %v534_v18 }
 0x121   :  { %v762_v22 = vpop.f32.mrf.mxu0 }
 0x122   :  { %v614_v23 = vadd.f32 %v613_v8, %v574_v21 }
 0x124   :  { %619 = vmax.xlane.f32.xlu0 %v614_v23 }
 0x1ad   :  { %v620_v24 = vpop.xlane.xlu0 %619 }
 0x1ae   :  { %v621_v25 = vsub.f32 %v614_v23, %v620_v24 }
 0x1b0   :  { %v622_v26 = vmul.f32 1.442695, %v621_v25 }
 0x1b2   :  { %828 = vpow2.f32 %v622_v26 }
 0x1bf   :  { %v829_v27 = vpop.eup %828 }
 0x1c0   :  { %624 = vadd.xlane.f32.xlu0 %v829_v27 }
 0x249   :  { %v625_v28 = vpop.xlane.xlu0 %624 }
 0x24a   :  { %830 = vrcp.f32 %v625_v28 }
 0x257   :  { %v831_v29 = vpop.eup %830 }
 0x258   :  { %v628_v30 = vmul.f32 %v831_v29, %v829_v27 }
 0x25a   :  { %v629_v31 = vpack.c.bf16 %v628_v30, %v628_v30 }
 0x25c   :  { %630 = vst [vmem:[#allocation7] sm:$0xf] %v629_v31 }
 0x25d   :  { %883 = shalt.err (!%p880_p0)
}
 0x25e   :  { %640 = dma.vmem_to_hbm [thread:$0]  %s638_s24, 64, %s940_s3, [#allocation4]  }
 0x25f   :  { %896 = dma.done.wait [#allocation4], 64  }
 0x260   :  { %897 = vsyncadd [#allocation4], 4294967232 }
 0x261   :  { %644 = vsyncpa [#allocation3], 1 }
 0x262   :  { %645 = vsyncpa [#allocation6], 1 }
 0x263   :  { %646 = vsyncpa [#allocation4], 1 }

</bundles_post_ra>
